<compile_context>
chip_gen: v7x
topology: tpu7x:2x2x1
jax: 0.10.0
libtpu: 0.0.40
codegen_flags: <defaults>
</compile_context>

<pallas_src>
import functools

import jax
import jax.numpy as jnp
from jax import lax
from jax.experimental import pallas as pl
from jax.experimental.pallas import tpu as pltpu


# ----------------------------------------------------------------------------
# Pallas kernel: fused im2col + per-patch element reorder (pure relayout).
# ----------------------------------------------------------------------------
def _relayout_kernel(x_ref, perm_ref, o_ref):
    # x_ref:    (C, t_h, p, W)   -- t_h rows of patches for one batch element
    # perm_ref: (C*p, C*p)       -- constant permutation: row (c*p+r) -> col (r*C+c)
    # o_ref:    (t_h, W, C*p)    -- contiguous output slabs, one per patch row
    c, t_h, p, w = x_ref.shape
    perm = perm_ref[...]                          # tiny, loaded once per grid step

    for t in range(t_h):                          # short static unroll
        # rows ordered (channel, in-patch-row), columns = full image width
        xb = x_ref[:, t, :, :].reshape(c * p, w)
        # xb.T : [W, C*p]; the MXU matmul applies the fixed column permutation,
        # giving zt[w, r*C + c] = x[b, c, hp*p + r, w]  (exact: 0/1 weights).
        zt = jnp.dot(xb.T, perm, preferred_element_type=jnp.float32)
        o_ref[t, :, :] = zt.astype(o_ref.dtype)


def _disjoint_patch_forward(x, perm, patch_size):
    """x: [B, C, H, W] (H, W divisible by patch_size) -> [B, Hp*Wp, C*p*p]."""
    B, C, H, W = x.shape
    p = patch_size
    Hp, Wp = H // p, W // p
    Cp = C * p

    # Patch-rows per grid step: largest divisor of Hp that keeps the unroll
    # short, the block <= ~1 MiB, and leaves >= 2 grid steps for megacore.
    t_h = 1
    for cand in range(min(Hp, 8), 1, -1):
        if Hp % cand == 0 \
                and cand * C * p * W * x.dtype.itemsize <= (1 << 20) \
                and B * (Hp // cand) >= 2:
            t_h = cand
            break

    # Free (contiguous) reshape: split H into (Hp, p) so block trailing dims
    # equal full array dims -> clean BlockSpec, no HBM copy.
    x5 = x.reshape(B, C, Hp, p, W)

    out = pl.pallas_call(
        _relayout_kernel,
        out_shape=jax.ShapeDtypeStruct((B, Hp, W, Cp), x.dtype),
        grid=(B, Hp // t_h),
        in_specs=[
            # One batch element, t_h patch rows, all channels / full width.
            pl.BlockSpec((None, C, t_h, p, W), lambda b, h: (b, 0, h, 0, 0)),
            # Tiny constant permutation matrix (same block every step).
            pl.BlockSpec((Cp, Cp), lambda b, h: (0, 0)),
        ],
        out_specs=pl.BlockSpec((None, t_h, W, Cp), lambda b, h: (b, h, 0, 0)),
        compiler_params=pltpu.CompilerParams(
            dimension_semantics=("parallel", "parallel")),
    )(x5, perm)

    # Free contiguous regroup: [B, Hp, W, C*p] == [B, Hp*Wp, C*p*p] in memory.
    return out.reshape(B, Hp * Wp, C * p * p)


# ----------------------------------------------------------------------------
# Module equivalent
# ----------------------------------------------------------------------------
class DisjointPatchMakerPallas:
    def __init__(self, channels, patch_size, patch_numel):
        assert patch_numel == channels * patch_size * patch_size
        self.channels = channels
        self.patch_size = patch_size
        self.patch_numel = patch_numel

        # Frozen conv-equivalent params (identity filter, zero bias) -- kept only
        # for API parity / reference checking; the kernel does not use them.
        k, c, w = patch_numel, channels, patch_size
        weight = jnp.zeros((k, c, w, w), dtype=jnp.float32)        # OIHW
        idx_k = jnp.arange(k)
        weight = weight.at[idx_k, idx_k % c, (idx_k // c) % w, idx_k // (c * w)].set(1.0)
        self.weight = weight
        self.bias = jnp.zeros((k,), dtype=jnp.float32)

        # In-kernel constant: (C*p, C*p) permutation, row (c*p + r) -> col (r*C + c).
        q = jnp.arange(c * w)
        self.perm = jnp.zeros((c * w, c * w), dtype=jnp.float32).at[
            q, (q % w) * c + q // w].set(1.0)

    @functools.partial(jax.jit, static_argnums=(0, 2))
    def forward(self, x, flat=False):
        assert x.ndim == 4, "Input shape should be [batch_size, channels, height, width]"
        B, C, H, W = x.shape
        p = self.patch_size
        Hp, Wp = H // p, W // p
        if H != Hp * p or W != Wp * p:
            # Conv with stride == kernel silently drops the remainder.
            x = x[:, :, :Hp * p, :Wp * p]

        out = _disjoint_patch_forward(x, self.perm.astype(x.dtype), p)

        # Matches conv -> permute(0, 2, 3, 1) -> view
        if flat:
            return out.reshape(-1, self.patch_numel)
        return out.reshape(B, Hp * Wp, self.patch_numel)

    # TODO(synk): inverse() (ConvTranspose2d) not required for the forward pass;
    # not implemented as a Pallas kernel here.


# ----------------------------------------------------------------------------
# Reference (pure JAX conv, mirrors torch.nn.Conv2d NCHW semantics)
# ----------------------------------------------------------------------------
def reference_forward(x, weight, bias, patch_size, patch_numel):
    y = lax.conv_general_dilated(
        x, weight,
        window_strides=(patch_size, patch_size),
        padding="VALID",
        dimension_numbers=("NCHW", "OIHW", "NCHW"),
    ) + bias.reshape(1, -1, 1, 1)
    B = x.shape[0]
    y = jnp.transpose(y, (0, 2, 3, 1))          # [B, Hp, Wp, K]
    return y.reshape(B, -1, patch_numel)


if __name__ == "__main__":
    # Small shapes consistent with the module:
    # channels=4, patch_size=4 -> patch_numel = 4*4*4 = 64, spatial 16 -> 16 patches.
    B, C, H, W = 2, 4, 16, 16
    patch_size = 4
    patch_numel = C * patch_size * patch_size

    key = jax.random.PRNGKey(0)
    x = jax.random.normal(key, (B, C, H, W), dtype=jnp.float32)

    module = DisjointPatchMakerPallas(C, patch_size, patch_numel)

    out = jax.block_until_ready(module.forward(x))   # [B, num_patches, patch_numel]

    ref = reference_forward(x, module.weight, module.bias, patch_size, patch_numel)
    assert out.shape == (B, (H // patch_size) * (W // patch_size), patch_numel), out.shape
    assert jnp.allclose(out, ref, atol=1e-5, rtol=1e-5), "mismatch vs reference conv"

    # Also exercise flat=True path.
    out_flat = jax.block_until_ready(module.forward(x, True))
    assert out_flat.shape == (B * 16, patch_numel)
    assert jnp.allclose(out_flat, ref.reshape(-1, patch_numel), atol=1e-5, rtol=1e-5)

    print("KERNEL_OK")
</pallas_src>

<mosaic_0001>
module attributes {stable_mosaic.version = 11 : i64} {
  func.func @_relayout_kernel(%arg0: i32, %arg1: i32, %arg2: memref<1x4x4x4x16xf32, #tpu.memory_space<vmem>>, %arg3: memref<16x16xf32, #tpu.memory_space<vmem>>, %arg4: memref<1x4x16x16xf32, #tpu.memory_space<vmem>>) attributes {dimension_semantics = [#tpu.dimension_semantics<parallel>, #tpu.dimension_semantics<parallel>], iteration_bounds = array<i64: 2, 1>, scalar_prefetch = 0 : i64, scratch_operands = 0 : i64, tpu.core_type = #tpu.core_type<tc>, window_params = [{transform_indices = @transform_0, window_bounds = array<i64: 1, 4, 4, 4, 16>}, {pipeline_mode = #tpu.pipeline_mode<synchronous>, transform_indices = @transform_1, window_bounds = array<i64: 16, 16>}, {transform_indices = @transform_2, window_bounds = array<i64: 1, 4, 16, 16>}]} {
    %c0 = arith.constant 0 : index
    %c0_0 = arith.constant 0 : index
    %0 = vector.load %arg3[%c0, %c0_0] : memref<16x16xf32, #tpu.memory_space<vmem>>, vector<16x16xf32>
    %c0_1 = arith.constant 0 : index
    %c0_2 = arith.constant 0 : index
    %c0_3 = arith.constant 0 : index
    %c0_4 = arith.constant 0 : index
    %c0_5 = arith.constant 0 : index
    %1 = vector.load %arg2[%c0_1, %c0_2, %c0_3, %c0_4, %c0_5] : memref<1x4x4x4x16xf32, #tpu.memory_space<vmem>>, vector<1x4x1x4x16xf32>
    %2 = vector.shape_cast %1 : vector<1x4x1x4x16xf32> to vector<4x4x16xf32>
    %3 = vector.shape_cast %2 : vector<4x4x16xf32> to vector<16x16xf32>
    %4 = tpu.transpose %3, [1, 0] : vector<16x16xf32> -> vector<16x16xf32>
    %cst = arith.constant dense<0.000000e+00> : vector<16x16xf32>
    %5 = tpu.matmul %4, %0, %cst {dimension_numbers = #tpu.dot_dimension_numbers<[1], [0], [0], [1], [0, 0, 1, 1], [], []>} : vector<16x16xf32>, vector<16x16xf32>, vector<16x16xf32> -> vector<16x16xf32>
    %c0_6 = arith.constant 0 : index
    %c0_7 = arith.constant 0 : index
    %c0_8 = arith.constant 0 : index
    %c0_9 = arith.constant 0 : index
    %6 = vector.load %arg4[%c0_6, %c0_7, %c0_8, %c0_9] : memref<1x4x16x16xf32, #tpu.memory_space<vmem>>, vector<1x1x16x16xf32>
    %7 = vector.shape_cast %6 : vector<1x1x16x16xf32> to vector<16x16xf32>
    %8 = vector.shape_cast %5 : vector<16x16xf32> to vector<1x1x16x16xf32>
    tpu.vector_store %arg4[%c0_6, %c0_7, %c0_8, %c0_9], %8 {strides = array<i32>} : memref<1x4x16x16xf32, #tpu.memory_space<vmem>>, vector<1x1x16x16xf32>,
    %c0_10 = arith.constant 0 : index
    %c0_11 = arith.constant 0 : index
    %c1 = arith.constant 1 : index
    %c0_12 = arith.constant 0 : index
    %c0_13 = arith.constant 0 : index
    %9 = vector.load %arg2[%c0_10, %c0_11, %c1, %c0_12, %c0_13] : memref<1x4x4x4x16xf32, #tpu.memory_space<vmem>>, vector<1x4x1x4x16xf32>
    %10 = vector.shape_cast %9 : vector<1x4x1x4x16xf32> to vector<4x4x16xf32>
    %11 = vector.shape_cast %10 : vector<4x4x16xf32> to vector<16x16xf32>
    %12 = tpu.transpose %11, [1, 0] : vector<16x16xf32> -> vector<16x16xf32>
    %cst_14 = arith.constant dense<0.000000e+00> : vector<16x16xf32>
    %13 = tpu.matmul %12, %0, %cst_14 {dimension_numbers = #tpu.dot_dimension_numbers<[1], [0], [0], [1], [0, 0, 1, 1], [], []>} : vector<16x16xf32>, vector<16x16xf32>, vector<16x16xf32> -> vector<16x16xf32>
    %c0_15 = arith.constant 0 : index
    %c1_16 = arith.constant 1 : index
    %c0_17 = arith.constant 0 : index
    %c0_18 = arith.constant 0 : index
    %14 = vector.load %arg4[%c0_15, %c1_16, %c0_17, %c0_18] : memref<1x4x16x16xf32, #tpu.memory_space<vmem>>, vector<1x1x16x16xf32>
    %15 = vector.shape_cast %14 : vector<1x1x16x16xf32> to vector<16x16xf32>
    %16 = vector.shape_cast %13 : vector<16x16xf32> to vector<1x1x16x16xf32>
    tpu.vector_store %arg4[%c0_15, %c1_16, %c0_17, %c0_18], %16 {strides = array<i32>} : memref<1x4x16x16xf32, #tpu.memory_space<vmem>>, vector<1x1x16x16xf32>,
    %c0_19 = arith.constant 0 : index
    %c0_20 = arith.constant 0 : index
    %c2 = arith.constant 2 : index
    %c0_21 = arith.constant 0 : index
    %c0_22 = arith.constant 0 : index
    %17 = vector.load %arg2[%c0_19, %c0_20, %c2, %c0_21, %c0_22] : memref<1x4x4x4x16xf32, #tpu.memory_space<vmem>>, vector<1x4x1x4x16xf32>
    %18 = vector.shape_cast %17 : vector<1x4x1x4x16xf32> to vector<4x4x16xf32>
    %19 = vector.shape_cast %18 : vector<4x4x16xf32> to vector<16x16xf32>
    %20 = tpu.transpose %19, [1, 0] : vector<16x16xf32> -> vector<16x16xf32>
    %cst_23 = arith.constant dense<0.000000e+00> : vector<16x16xf32>
    %21 = tpu.matmul %20, %0, %cst_23 {dimension_numbers = #tpu.dot_dimension_numbers<[1], [0], [0], [1], [0, 0, 1, 1], [], []>} : vector<16x16xf32>, vector<16x16xf32>, vector<16x16xf32> -> vector<16x16xf32>
    %c0_24 = arith.constant 0 : index
    %c2_25 = arith.constant 2 : index
    %c0_26 = arith.constant 0 : index
    %c0_27 = arith.constant 0 : index
    %22 = vector.load %arg4[%c0_24, %c2_25, %c0_26, %c0_27] : memref<1x4x16x16xf32, #tpu.memory_space<vmem>>, vector<1x1x16x16xf32>
    %23 = vector.shape_cast %22 : vector<1x1x16x16xf32> to vector<16x16xf32>
    %24 = vector.shape_cast %21 : vector<16x16xf32> to vector<1x1x16x16xf32>
    tpu.vector_store %arg4[%c0_24, %c2_25, %c0_26, %c0_27], %24 {strides = array<i32>} : memref<1x4x16x16xf32, #tpu.memory_space<vmem>>, vector<1x1x16x16xf32>,
    %c0_28 = arith.constant 0 : index
    %c0_29 = arith.constant 0 : index
    %c3 = arith.constant 3 : index
    %c0_30 = arith.constant 0 : index
    %c0_31 = arith.constant 0 : index
    %25 = vector.load %arg2[%c0_28, %c0_29, %c3, %c0_30, %c0_31] : memref<1x4x4x4x16xf32, #tpu.memory_space<vmem>>, vector<1x4x1x4x16xf32>
    %26 = vector.shape_cast %25 : vector<1x4x1x4x16xf32> to vector<4x4x16xf32>
    %27 = vector.shape_cast %26 : vector<4x4x16xf32> to vector<16x16xf32>
    %28 = tpu.transpose %27, [1, 0] : vector<16x16xf32> -> vector<16x16xf32>
    %cst_32 = arith.constant dense<0.000000e+00> : vector<16x16xf32>
    %29 = tpu.matmul %28, %0, %cst_32 {dimension_numbers = #tpu.dot_dimension_numbers<[1], [0], [0], [1], [0, 0, 1, 1], [], []>} : vector<16x16xf32>, vector<16x16xf32>, vector<16x16xf32> -> vector<16x16xf32>
    %c0_33 = arith.constant 0 : index
    %c3_34 = arith.constant 3 : index
    %c0_35 = arith.constant 0 : index
    %c0_36 = arith.constant 0 : index
    %30 = vector.load %arg4[%c0_33, %c3_34, %c0_35, %c0_36] : memref<1x4x16x16xf32, #tpu.memory_space<vmem>>, vector<1x1x16x16xf32>
    %31 = vector.shape_cast %30 : vector<1x1x16x16xf32> to vector<16x16xf32>
    %32 = vector.shape_cast %29 : vector<16x16xf32> to vector<1x1x16x16xf32>
    tpu.vector_store %arg4[%c0_33, %c3_34, %c0_35, %c0_36], %32 {strides = array<i32>} : memref<1x4x16x16xf32, #tpu.memory_space<vmem>>, vector<1x1x16x16xf32>,
    return
  }
  func.func @transform_0(%arg0: i32, %arg1: i32) -> (i32, i32, i32, i32, i32) {
    %c0_i32 = arith.constant 0 : i32
    %c0_i32_0 = arith.constant 0 : i32
    %c0_i32_1 = arith.constant 0 : i32
    %c0_i32_2 = arith.constant 0 : i32
    return %arg0, %c0_i32, %arg1, %c0_i32_0, %c0_i32_1 : i32, i32, i32, i32, i32
  }
  func.func @transform_1(%arg0: i32, %arg1: i32) -> (i32, i32) {
    %c0_i32 = arith.constant 0 : i32
    %c0_i32_0 = arith.constant 0 : i32
    %c0_i32_1 = arith.constant 0 : i32
    return %c0_i32, %c0_i32_0 : i32, i32
  }
  func.func @transform_2(%arg0: i32, %arg1: i32) -> (i32, i32, i32, i32) {
    %c0_i32 = arith.constant 0 : i32
    %c0_i32_0 = arith.constant 0 : i32
    %c0_i32_1 = arith.constant 0 : i32
    return %arg0, %arg1, %c0_i32, %c0_i32_0 : i32, i32, i32, i32
  }
}

</mosaic_0001>

<bundles_post_ra>
// kernel: forward.1
= control target key start
LH: loop header
LB: loop body
LE: loop exit
PB: predicated region body
PF: predicated region fallthrough
CT: control target
= control target key end

     0   :  { %7 = vsyncpa [#allocation3], 0  ;;  %s1328_s0 = inlined_call_operand.hbm [shape: f32[2,4,4,4,16], index: 0, kind: input, shape index: {}]   ;;  %s1329_s1 = inlined_call_operand.hbm [shape: f32[16,16], index: 1, kind: input, shape index: {}]   ;;  %s1330_s2 = inlined_call_operand.vmem [shape: f32[2,4,16,16], index: 2, kind: output, shape index: {}]  }
   0x1   :  { %9 = vsyncpa [#allocation3 + $0x1], 0 }
   0x2   :  { %10 = vsyncpa [#allocation5], 0  ;;  %s1154_s9 = smov 0   ;;  %s1156_s10 = smov 0  }
   0x3   :  { %s1158_s11 = smov 0   ;;  %s1160_s12 = smov 0  }
   0x4   :  { %s1162_s13 = smov 0   ;;  %s1164_s14 = smov 0  }
   0x5 LB: > { %s837_s15 = sadd.s32 4294967295, %s1131_s14   ;;  %p50_p0 = scmp.ne.s32.totalorder %s1115_s10, %s1111_s9  ;;  %s1131_s14 = sphi %s1164_s14, %s16_s14   ;;  %s1127_s13 = sphi %s1162_s13, %s1347_s13   ;;  %s1123_s12 = sphi %s1160_s12, %s1346_s12   ;;  %s1119_s11 = sphi %s1158_s11, %s1345_s11   ;;  %s1115_s10 = sphi %s1156_s10, %s1344_s10   ;;  %s1111_s9 = sphi %s1154_s9, %s1343_s9  }
   0x6   : > { %p1184_p1 = scmp.eq.s32.totalorder %s837_s15, 0  ;;  %p839_p2 = scmp.ge.s32.totalorder %s1131_s14, 1 }
   0x7   : > { %p110_p3 = scmp.lt.s32.totalorder %s1131_s14, 3  ;;  %s1133_s19 = smov [#allocation4]  }
   0x8   : > { %s1335_s16 = scalar_select %p1184_p1, 1, 0 }
   0x9   : > { %p1192_p4 = por %p1184_p1, %p50_p0  ;;  %p1196_p5 = pnand %p839_p2, %p110_p3 }
   0xa   : > { %s122_s20 = sshll.u32 %s1133_s19, 4  ;;  %s28_s22 = sadd.s32 1, %s1127_s13  ;;  %s123_s20 = int_to_ptr.vmem [resolvable:$true] %s122_s20 }
   0xb   : > { %s1336_s17 = scalar_select %p1192_p4, 1, 0 }
   0xc   : > { %s1337_s18 = scalar_select %p1196_p5, 1, 0 }
   0xd   : > { %p946_p6 = pneg %p1196_p5  ;;  %s1019_s25 = scalar_lea.hbm %s1329_s1, 256 }
   0xe   : > { %p1020_p8 = scmp.ne.s32.totalorder %s1329_s1, %s1019_s25  ;;  %p1026_p12 = scmp.lt.u32.totalorder %s1019_s25, %s1329_s1 }
   0xf   : > { %p1204_p7 = pnand %p946_p6, %p1184_p1 }
  0x11   : > { %p1021_p9 = pneg %p1204_p7 }
  0x13   : > { %p1022_p10 = pnand %p1021_p9, %p1020_p8 }
  0x15   : > { %p1023_p11 = pneg %p1022_p10 }
  0x17   : > { %p1028_p13 = pnand %p1026_p12, %p1023_p11 }
  0x19   : > { %1031 = shalt.err (!%p1028_p13)
}
  0x1a   : > { %s1032_s30 = scalar_lea.vmem %s123_s20, 256  ;;  %p1040_p6 = scmp.lt.s32.totalorder %s123_s20, %s123_s20 }
  0x1b   : > { %p1033_p0 = scmp.ne.s32.totalorder %s123_s20, %s1032_s30  ;;  %p1041_p1 = scmp.lt.s32.totalorder %s1032_s30, %s1032_s30 }
  0x1d   : > { %p1035_p2 = pnand %p1033_p0, %p1021_p9  ;;  %p1042_p4 = por %p1041_p1, %p1040_p6 }
  0x1f   : > { %p1036_p3 = pneg %p1035_p2 }
  0x21   : > { %p1043_p5 = pnand %p1042_p4, %p1036_p3 }
  0x23   : > { %1046 = shalt.err (!%p1043_p5)
}
  0x24   : > { %s1134_s3 = smov 128   ;;  %s1135_s4 = smov 8  }
  0x25   : > { %949 = dma.hbm_to_vmem [thread:$0]  (!%p1204_p7), %s1329_s1, 256, %s123_s20, [#allocation5], %s1134_s3, %s1134_s3, %s1135_s4  }
  0x26   : > { %p30_p1 = scmp.ge.s32.totalorder %s28_s22, 2  ;;  %s37_s7 = sadd.s32 1, %s1119_s11 }
  0x27   : > { %p44_p4 = scmp.ne.s32.totalorder %s1119_s11, %s1115_s10  ;;  %p45_p5 = scmp.eq.s32.totalorder %s1131_s14, 0 }
  0x28   : > { %s1349_s22 = smov (%p30_p1, %s28_s22), 0  ;;  %p955_p9 = scmp.lt.s32.totalorder %s1131_s14, 2 }
  0x29   : > { %p46_p8 = por %p45_p5, %p44_p4  ;;  %s32_s8 = ssub.s32 %s1127_s13, %s1349_s22 }
  0x2a   : > { %s136_s9 = sand.u32 1, %s1119_s11   ;;  %p35_p10 = scmp.eq.s32.totalorder %s32_s8, 0 }
  0x2b   : > { %s842_s15 = sshll.u32 %s136_s9, 6  ;;  %s878_s19 = sshll.u32 %s1127_s13, 10 }
  0x2c   : > { %s1237_s23 = scalar_select %p35_p10, %s1119_s11, %s37_s7  }
  0x2d   : > { %s1242_s20 = scalar_lea.hbm %s1328_s0, %s878_s19  ;;  %s140_s25 = scalar_lea.vmem [#allocation2], %s842_s15 }
  0x2e   : > { %s149_s26 = sshll.u32 %s140_s25, 4  ;;  %p1244_p7 = pnand %p955_p9, %p46_p8  ;;  %s1248_s26 = int_to_ptr.vmem [resolvable:$true] %s149_s26 }
  0x2f   : > { %s1250_s28 = scalar_lea.sflag [#allocation3], %s136_s9  ;;  %s1047_s29 = scalar_lea.hbm %s1242_s20, 1024 }
  0x30   : > { %p1048_p11 = scmp.ne.s32.totalorder %s1242_s20, %s1047_s29  ;;  %p1049_p12 = pneg %p1244_p7 }
  0x31   : > { %s1052_s4 = scalar_lea.hbm %s1328_s0, 2048  ;;  %p1053_p2 = scmp.lt.u32.totalorder %s1242_s20, %s1328_s0 }
  0x32   : > { %p1050_p13 = pnand %p1049_p12, %p1048_p11  ;;  %p1054_p3 = scmp.lt.u32.totalorder %s1052_s4, %s1047_s29 }
  0x33   : > { %p1056_p1 = scmp.lt.u32.totalorder %s1047_s29, %s1242_s20 }
  0x34   : > { %p1051_p0 = pneg %p1050_p13  ;;  %p1055_p6 = por %p1054_p3, %p1053_p2 }
  0x36   : > { %p1057_p4 = por %p1056_p1, %p1055_p6 }
  0x38   : > { %p1058_p5 = pnand %p1057_p4, %p1051_p0 }
  0x3a   : > { %1061 = shalt.err (!%p1058_p5)
}
  0x3b   : > { %s1062_s7 = scalar_lea.vmem %s1248_s26, 1024  ;;  %s1136_s8 = smov [#allocation2]  }
  0x3c   : > { %p1063_p8 = scmp.ne.s32.totalorder %s1248_s26, %s1062_s7  ;;  %s1067_s9 = sshll.u32 %s1136_s8, 4  ;;  %s1068_s9 = int_to_ptr.vmem [resolvable:$false] %s1067_s9 }
  0x3d   : > { %s1069_s15 = scalar_lea.vmem %s1068_s9, 2048  ;;  %p1070_p11 = scmp.lt.s32.totalorder %s1248_s26, %s1068_s9 }
  0x3e   : > { %p1065_p9 = pnand %p1063_p8, %p1049_p12  ;;  %p1071_p13 = scmp.lt.s32.totalorder %s1069_s15, %s1062_s7 }
  0x40   : > { %p1066_p10 = pneg %p1065_p9  ;;  %p1072_p2 = por %p1071_p13, %p1070_p11 }
  0x42   : > { %p1073_p3 = pnand %p1072_p2, %p1066_p10 }
  0x44   : > { %1076 = shalt.err (!%p1073_p3)
}
  0x45   : > { %s1137_s19 = smov 64   ;;  %s1138_s21 = smov 4  }
  0x46   : > { %953 = dma.hbm_to_vmem [thread:$0]  (!%p1244_p7), %s1242_s20, 1024, %s1248_s26, %s1250_s28, %s1137_s19, %s1137_s19, %s1138_s21  }
  0x47   : > { %p1340_p12 = scmp.ne.s32.totalorder %s1337_s18, 0 }
  0x48   : > { %s163_s24 = sand.u32 (!%p1340_p12), 1, %s1115_s10   ;;  %p1341_p0 = scmp.ne.s32.totalorder (!%p1340_p12), %s1336_s17, 0 }
  0x49   : > { %161 = sbr.rel (%p1340_p12) target bundleno = 440 (0x1b8), region = 28  ;;  %s846_s25 = sshll.u32 (!%p1340_p12), %s163_s24, 6 }
  0x4a   : > { %s164_s29 = scalar_lea.sflag (!%p1340_p12), [#allocation3], %s163_s24  ;;  %s167_s30 = scalar_lea.vmem (!%p1340_p12), [#allocation2], %s846_s25 }
  0x50   : > { %1102 = dma.done.wait (%p1341_p0), %s164_s29, 1024  }
  0x51   : > { %1104 = vsyncadd (%p1341_p0), %s164_s29, 4294966272  ;;  %p1342_p6 = scmp.ne.s32.totalorder %s1335_s16, 0 }
  0x53   : > { %1106 = dma.done.wait (%p1342_p6), [#allocation5], 256  }
  0x54   : > { %1108 = vsyncadd (%p1342_p6), [#allocation5], 4294967040  ;;  %v1011_v0 = vld [vmem:[%s167_s30 + $0x4] ss:$16 sps:$4 sm:$0xff]   ;;  %v1012_v1 = vld [vmem:[%s167_s30] ss:$16 sps:$4 sm:$0xff]  }
  0x55   : > { %352 = vxpose.xlu1.b32.start [1/2] (short) (narrow) %v1011_v0, 16  ;;  %v209_v2 = vld [vmem:[#allocation4] sm:$0xff]  ;;  %223 = vxpose.xlu0.b32.start [1/2] (short) (narrow) %v1012_v1, 16  ;;  %v210_v4 = vld [vmem:[#allocation4 + $0x8] sm:$0xff]  ;;  %vm255_vm0 = vcmask 130048   ;;  %p199_p7 = scmp.lt.s32.totalorder %s1123_s12, 1 }
  0x56   : > { %v1013_v3 = vld [vmem:[%s167_s30 + $0x24] ss:$16 sps:$4 sm:$0xff]   ;;  %v1014_v5 = vld [vmem:[%s167_s30 + $0x20] ss:$16 sps:$4 sm:$0xff]   ;;  %v924_v6 = vpack.c.bf16 %v210_v4, %v209_v2  ;;  %v1015_v7 = vld [vmem:[%s167_s30 + $0xc] ss:$16 sps:$4 sm:$0xff]  }
  0x57   : > { %v1016_v8 = vld [vmem:[%s167_s30 + $0x8] ss:$16 sps:$4 sm:$0xff]   ;;  %v1017_v9 = vld [vmem:[%s167_s30 + $0x2c] ss:$16 sps:$4 sm:$0xff]   ;;  %s1351_s12 = smov (!%p199_p7, %s1123_s12), 1 }
  0x58   : > { %925 = vmatprep.subr.bf16.mxu0 %v924_v6  ;;  %929 = vmatprep.subr.bf16.mxu1 %v924_v6  ;;  %v1018_v10 = vld [vmem:[%s167_s30 + $0x28] ss:$16 sps:$4 sm:$0xff]   ;;  %s879_s16 = sshll.u32 %s1351_s12, 6 }
  0x59   : > { %353 = vxpose.xlu1.b32.end [2/2] (short) (narrow) %v1013_v3, 16  ;;  %224 = vxpose.xlu0.b32.end [2/2] (short) (narrow) %v1014_v5, 16  ;;  %s207_s20 = scalar_lea.vmem %s1330_s2, %s879_s16 }
  0x5a   : > { %927 = vmatpush3.bf16.msra.mxu0 %v924_v6  ;;  %931 = vmatpush3.bf16.msra.mxu1 %v924_v6 }
  0x5b   : > { %933 = vmatprep.subr.bf16.mxu0 %v924_v6  ;;  %937 = vmatprep.subr.bf16.mxu1 %v924_v6 }
  0x5d   : > { %610 = vxpose.xlu1.b32.start [1/2] (short) (narrow) %v1015_v7, 16  ;;  %481 = vxpose.xlu0.b32.start [1/2] (short) (narrow) %v1016_v8, 16 }
  0x61   : > { %611 = vxpose.xlu1.b32.end [2/2] (short) (narrow) %v1017_v9, 16  ;;  %482 = vxpose.xlu0.b32.end [2/2] (short) (narrow) %v1018_v10, 16 }
  0xd5   : > { %v368_v11 = vpop.trf.xlu1  ;;  %v239_v12 = vpop.trf.xlu0 }
  0xd6   : > { %907 = vmatprep.mubr.msk.f32.mxu1 %vm255_vm0, %v368_v11  ;;  %900 = vmatprep.mubr.msk.f32.mxu0 %vm255_vm0, %v239_v12 }
  0xd9   : > { %v369_v13 = vpop.trf.xlu1  ;;  %v240_v14 = vpop.trf.xlu0 }
  0xda   : > { %908 = vmatmul.mubr.msk.f32.vlgmr.msra.gmra.mrb[0].mxu1 %vm255_vm0, %v369_v13  ;;  %901 = vmatmul.mubr.msk.f32.vlgmr.msra.gmra.mrb[0].mxu0 %vm255_vm0, %v240_v14 }
  0xdb   : > { %939 = vmatpush3.bf16.msra.mxu1 %v924_v6  ;;  %935 = vmatpush3.bf16.msra.mxu0 %v924_v6 }
  0xdd   : > { %v626_v15 = vpop.trf.xlu1  ;;  %v497_v16 = vpop.trf.xlu0 }
  0xde   : > { %921 = vmatprep.mubr.msk.f32.mxu1 %vm255_vm0, %v626_v15  ;;  %914 = vmatprep.mubr.msk.f32.mxu0 %vm255_vm0, %v497_v16 }
  0xe1   : > { %v627_v17 = vpop.trf.xlu1  ;;  %v498_v18 = vpop.trf.xlu0 }
  0xe2   : > { %922 = vmatmul.mubr.msk.f32.vlgmr.msra.gmra.mrb[2].mxu1 %vm255_vm0, %v627_v17  ;;  %915 = vmatmul.mubr.msk.f32.vlgmr.msra.gmra.mrb[2].mxu0 %vm255_vm0, %v498_v18 }
 0x1ad   : > { %v909_v19 = vpop.f32.mrb[0].mxu1  ;;  %v902_v20 = vpop.f32.mrb[0].mxu0 }
 0x1ae   : > { %859 = vst.msk [vmem:[%s207_s20 + $0x18] sm:$0xff] %vm255_vm0, %v909_v19  ;;  %v456_v21 = vpop.f32.mrb[1].mxu1  ;;  %338 = vst.msk [vmem:[%s207_s20 + $0x8] sm:$0xff] %vm255_vm0, %v902_v20  ;;  %v328_v22 = vpop.f32.mrb[1].mxu0 }
 0x1af   : > { %858 = vst.msk [vmem:[%s207_s20 + $0x10] sm:$0xff] %vm255_vm0, %v456_v21  ;;  %337 = vst.msk [vmem:[%s207_s20] sm:$0xff] %vm255_vm0, %v328_v22 }
 0x1b5   : > { %v923_v23 = vpop.f32.mrb[2].mxu1  ;;  %v916_v24 = vpop.f32.mrb[2].mxu0 }
 0x1b6   : > { %875 = vst.msk [vmem:[%s207_s20 + $0x38] sm:$0xff] %vm255_vm0, %v923_v23  ;;  %v714_v25 = vpop.f32.mrb[3].mxu1  ;;  %867 = vst.msk [vmem:[%s207_s20 + $0x28] sm:$0xff] %vm255_vm0, %v916_v24  ;;  %v585_v26 = vpop.f32.mrb[3].mxu0 }
 0x1b7   : > { %874 = vst.msk [vmem:[%s207_s20 + $0x30] sm:$0xff] %vm255_vm0, %v714_v25  ;;  %866 = vst.msk [vmem:[%s207_s20 + $0x20] sm:$0xff] %vm255_vm0, %v585_v26 }
 0x1b8 PF: > { %s16_s14 = sadd.s32 1, %s1131_s14   ;;  %s1343_s9 = smov %s1115_s10 }
 0x1b9   : > { %p13_p1 = scmp.ge.s32.totalorder %s16_s14, 4   ;;  %s1344_s10 = smov %s1119_s11 }
 0x1ba   : > { %s1345_s11 = smov %s1237_s23  ;;  %s1346_s12 = smov %s1127_s13 }
 0x1bb   : > { %s1347_s13 = smov %s1349_s22  ;;  %15 = sbr.rel (!%p13_p1) target bundleno = 5 (0x5), region = 78 }
 0x1c2   :  { %758 = vsyncpa [#allocation3], 1 }
 0x1c3   :  { %760 = vsyncpa [#allocation3 + $0x1], 1 }
 0x1c4   :  { %761 = vsyncpa [#allocation5], 1 }

</bundles_post_ra>
